<compile_context>
chip_gen: v7x
topology: tpu7x:2x2x1
jax: 0.10.0
libtpu: 0.0.40
codegen_flags: <defaults>
</compile_context>

<pallas_src>
import jax
import jax.numpy as jnp
from jax.experimental import pallas as pl
from jax.experimental.pallas import tpu as pltpu


# ----------------------------------------------------------------------------
# Fused kernel: full bidirectional recurrence + Linear head + sigmoid.
#   x_ref   : (T, B, 2I)  with x_ref[t] = [x_fwd[t] | x_bwd[T-1-t]]
#   wih_ref : (2I, 2H)    block-diag of Wih_f^T, Wih_b^T
#   whh_ref : (2H, 2H)    block-diag of Whh_f^T, Whh_b^T
#   b_ref   : (B, 2H)     [b_f | b_b] pre-broadcast over batch
#   wlf_ref : (B, 2H)     [wl_fwd | 0] pre-broadcast over batch
#   wlb_ref : (B, 2H)     [0 | wl_bwd] pre-broadcast over batch
#   bl_ref  : (1,) SMEM   head bias scalar
#   out_ref : (B, T)      sigmoid(logits), time along lanes
# ----------------------------------------------------------------------------
def fused_birnn_kernel(x_ref, wih_ref, whh_ref, b_ref, wlf_ref, wlb_ref,
                       bl_ref, out_ref):
    T, B, _ = x_ref.shape
    H2 = whh_ref.shape[0]

    # Hoisted loads (no per-step reloads / broadcasts inside the unrolled loop).
    wih = wih_ref[...]
    whh = whh_ref[...]
    bias = b_ref[...]
    wlf = wlf_ref[...]
    wlb = wlb_ref[...]
    bl = bl_ref[0]

    # Hidden state for both directions carried as a register value.
    h_cat = jnp.zeros((B, H2), jnp.float32)

    p_f = [None] * T   # forward head contribution, indexed by output time
    p_b = [None] * T   # backward head contribution, indexed by output time

    # Fully unrolled time loop (T is small and static).
    for t in range(T):
        x_cat = x_ref[t]                                    # (B, 2I)
        h_cat = jnp.tanh(
            jnp.dot(x_cat, wih, preferred_element_type=jnp.float32)
            + jnp.dot(h_cat, whh, preferred_element_type=jnp.float32)
            + bias)
        # Head contributions via VPU multiply + lane reduction (no N=1 matmul).
        p_f[t] = jnp.sum(h_cat * wlf, axis=-1, keepdims=True)         # (B, 1)
        p_b[T - 1 - t] = jnp.sum(h_cat * wlb, axis=-1, keepdims=True)  # (B, 1)

    logits = jnp.concatenate([p_f[t] + p_b[t] for t in range(T)], axis=-1)  # (B, T)
    out_ref[...] = jax.nn.sigmoid(logits + bl)


# ----------------------------------------------------------------------------
# Wrapper
# ----------------------------------------------------------------------------
def rnn_forward(x, params):
    """x: (B, T, I) batch-first, float32. Returns (B, T, 1)."""
    B, T, I = x.shape
    H = params["whh_f"].shape[0]
    H2 = 2 * H

    x_tm = jnp.transpose(x, (1, 0, 2)).astype(jnp.float32)      # (T, B, I)
    # x_cat[t] = [x[t] | x[T-1-t]]  -> both directions read the same row.
    x_cat = jnp.concatenate([x_tm, x_tm[::-1]], axis=-1)        # (T, B, 2I)

    zI = jnp.zeros((I, H), jnp.float32)
    zH = jnp.zeros((H, H), jnp.float32)
    wih_cat = jnp.concatenate(
        [jnp.concatenate([params["wih_f"].T, zI], axis=1),
         jnp.concatenate([zI, params["wih_b"].T], axis=1)], axis=0)   # (2I, 2H)
    whh_cat = jnp.concatenate(
        [jnp.concatenate([params["whh_f"].T, zH], axis=1),
         jnp.concatenate([zH, params["whh_b"].T], axis=1)], axis=0)   # (2H, 2H)

    b_cat = jnp.concatenate([params["bih_f"] + params["bhh_f"],
                             params["bih_b"] + params["bhh_b"]])      # (2H,)
    b_cat = jnp.broadcast_to(b_cat[None, :], (B, H2))

    wl = params["wl"].astype(jnp.float32)                             # (1, 2H)
    zero1H = jnp.zeros((1, H), jnp.float32)
    wlf = jnp.broadcast_to(jnp.concatenate([wl[:, :H], zero1H], axis=1), (B, H2))
    wlb = jnp.broadcast_to(jnp.concatenate([zero1H, wl[:, H:]], axis=1), (B, H2))
    bl = params["bl"].reshape(1).astype(jnp.float32)                  # (1,) scalar

    y = pl.pallas_call(
        fused_birnn_kernel,
        out_shape=jax.ShapeDtypeStruct((B, T), jnp.float32),
        in_specs=[
            pl.BlockSpec((T, B, 2 * I), lambda: (0, 0, 0)),   # x_cat (VMEM)
            pl.BlockSpec((2 * I, H2), lambda: (0, 0)),        # Wih block-diag
            pl.BlockSpec((H2, H2), lambda: (0, 0)),           # Whh block-diag
            pl.BlockSpec((B, H2), lambda: (0, 0)),            # bias (pre-broadcast)
            pl.BlockSpec((B, H2), lambda: (0, 0)),            # head w fwd (padded)
            pl.BlockSpec((B, H2), lambda: (0, 0)),            # head w bwd (padded)
            pl.BlockSpec(memory_space=pltpu.MemorySpace.SMEM),  # head bias scalar
        ],
        out_specs=pl.BlockSpec((B, T), lambda: (0, 0)),
    )(x_cat, wih_cat, whh_cat, b_cat, wlf, wlb, bl)

    # Dropout(0.5) in eval mode == identity.
    return y[..., None]                                        # (B, T, 1)


# ----------------------------------------------------------------------------
# Pure-JAX reference (for a sanity check)
# ----------------------------------------------------------------------------
def rnn_forward_ref(x, p):
    B, T, I = x.shape
    H = p["whh_f"].shape[0]
    xt = jnp.transpose(x, (1, 0, 2))                         # (T, B, I)
    h0 = jnp.zeros((B, H), jnp.float32)

    def step_f(h, x_t):
        h = jnp.tanh(x_t @ p["wih_f"].T + h @ p["whh_f"].T + p["bih_f"] + p["bhh_f"])
        return h, h

    def step_b(h, x_t):
        h = jnp.tanh(x_t @ p["wih_b"].T + h @ p["whh_b"].T + p["bih_b"] + p["bhh_b"])
        return h, h

    _, hf = jax.lax.scan(step_f, h0, xt)                     # (T, B, H)
    _, hb_rev = jax.lax.scan(step_b, h0, xt[::-1])
    hb = hb_rev[::-1]
    rnn_out = jnp.concatenate([hf, hb], axis=-1)             # (T, B, 2H)
    logits = rnn_out @ p["wl"].T + p["bl"]
    return jnp.transpose(jax.nn.sigmoid(logits), (1, 0, 2))  # (B, T, 1)


def init_params(key, input_size, hidden):
    k = 1.0 / jnp.sqrt(hidden)
    keys = jax.random.split(key, 10)
    u = lambda kk, shape: jax.random.uniform(kk, shape, jnp.float32, -k, k)
    kl = 1.0 / jnp.sqrt(2 * hidden)
    return {
        "wih_f": u(keys[0], (hidden, input_size)),
        "whh_f": u(keys[1], (hidden, hidden)),
        "bih_f": u(keys[2], (hidden,)),
        "bhh_f": u(keys[3], (hidden,)),
        "wih_b": u(keys[4], (hidden, input_size)),
        "whh_b": u(keys[5], (hidden, hidden)),
        "bih_b": u(keys[6], (hidden,)),
        "bhh_b": u(keys[7], (hidden,)),
        "wl": jax.random.uniform(keys[8], (1, 2 * hidden), jnp.float32, -kl, kl),
        "bl": jax.random.uniform(keys[9], (1,), jnp.float32, -kl, kl),
    }


if __name__ == "__main__":
    B, T, I, H = 8, 8, 27, 32

    key = jax.random.PRNGKey(0)
    k_p, k_x = jax.random.split(key)
    params = init_params(k_p, I, H)
    x = jax.random.normal(k_x, (B, T, I), jnp.float32)

    out = jax.block_until_ready(rnn_forward(x, params))
    ref = jax.block_until_ready(rnn_forward_ref(x, params))

    assert out.shape == (B, T, 1), out.shape
    assert jnp.allclose(out, ref, atol=2e-5, rtol=1e-4), float(jnp.max(jnp.abs(out - ref)))

    print("KERNEL_OK")
</pallas_src>

<mosaic_0001>
module attributes {stable_mosaic.version = 11 : i64} {
  func.func @fused_birnn_kernel(%arg0: memref<8x8x54xf32, #tpu.memory_space<vmem>>, %arg1: memref<54x64xf32, #tpu.memory_space<vmem>>, %arg2: memref<64x64xf32, #tpu.memory_space<vmem>>, %arg3: memref<8x64xf32, #tpu.memory_space<vmem>>, %arg4: memref<8x64xf32, #tpu.memory_space<vmem>>, %arg5: memref<8x64xf32, #tpu.memory_space<vmem>>, %arg6: memref<1xf32, #tpu.memory_space<smem>>, %arg7: memref<8x8xf32, #tpu.memory_space<vmem>>) attributes {dimension_semantics = [], scalar_prefetch = 0 : i64, scratch_operands = 0 : i64, tpu.core_type = #tpu.core_type<tc>} {
    %c0 = arith.constant 0 : index
    %c0_0 = arith.constant 0 : index
    %0 = vector.load %arg1[%c0, %c0_0] : memref<54x64xf32, #tpu.memory_space<vmem>>, vector<54x64xf32>
    %c0_1 = arith.constant 0 : index
    %c0_2 = arith.constant 0 : index
    %1 = vector.load %arg2[%c0_1, %c0_2] : memref<64x64xf32, #tpu.memory_space<vmem>>, vector<64x64xf32>
    %c0_3 = arith.constant 0 : index
    %c0_4 = arith.constant 0 : index
    %2 = vector.load %arg3[%c0_3, %c0_4] : memref<8x64xf32, #tpu.memory_space<vmem>>, vector<8x64xf32>
    %c0_5 = arith.constant 0 : index
    %c0_6 = arith.constant 0 : index
    %3 = vector.load %arg4[%c0_5, %c0_6] : memref<8x64xf32, #tpu.memory_space<vmem>>, vector<8x64xf32>
    %c0_7 = arith.constant 0 : index
    %c0_8 = arith.constant 0 : index
    %4 = vector.load %arg5[%c0_7, %c0_8] : memref<8x64xf32, #tpu.memory_space<vmem>>, vector<8x64xf32>
    %c0_9 = arith.constant 0 : index
    %5 = memref.load %arg6[%c0_9] : memref<1xf32, #tpu.memory_space<smem>>
    %cst = arith.constant 0.000000e+00 : f32
    %6 = vector.broadcast %cst : f32 to vector<8x64xf32>
    %c0_10 = arith.constant 0 : index
    %c0_11 = arith.constant 0 : index
    %c0_12 = arith.constant 0 : index
    %7 = vector.load %arg0[%c0_10, %c0_11, %c0_12] : memref<8x8x54xf32, #tpu.memory_space<vmem>>, vector<1x8x54xf32>
    %8 = vector.shape_cast %7 : vector<1x8x54xf32> to vector<8x54xf32>
    %cst_13 = arith.constant dense<0.000000e+00> : vector<8x64xf32>
    %9 = tpu.matmul %8, %0, %cst_13 {dimension_numbers = #tpu.dot_dimension_numbers<[1], [0], [0], [1], [0, 0, 1, 1], [], []>} : vector<8x54xf32>, vector<54x64xf32>, vector<8x64xf32> -> vector<8x64xf32>
    %cst_14 = arith.constant dense<0.000000e+00> : vector<8x64xf32>
    %10 = tpu.matmul %6, %1, %cst_14 {dimension_numbers = #tpu.dot_dimension_numbers<[1], [0], [0], [1], [0, 0, 1, 1], [], []>} : vector<8x64xf32>, vector<64x64xf32>, vector<8x64xf32> -> vector<8x64xf32>
    %11 = arith.addf %9, %10 : vector<8x64xf32>
    %12 = arith.addf %11, %2 : vector<8x64xf32>
    %13 = math.tanh %12 : vector<8x64xf32>
    %14 = arith.mulf %13, %3 : vector<8x64xf32>
    %cst_15 = arith.constant dense<0.000000e+00> : vector<8xf32>
    %15 = vector.multi_reduction <add>, %14, %cst_15 [1] : vector<8x64xf32> to vector<8xf32>
    %16 = vector.shape_cast %15 : vector<8xf32> to vector<8x1xf32>
    %17 = arith.mulf %13, %4 : vector<8x64xf32>
    %cst_16 = arith.constant dense<0.000000e+00> : vector<8xf32>
    %18 = vector.multi_reduction <add>, %17, %cst_16 [1] : vector<8x64xf32> to vector<8xf32>
    %19 = vector.shape_cast %18 : vector<8xf32> to vector<8x1xf32>
    %c1 = arith.constant 1 : index
    %c0_17 = arith.constant 0 : index
    %c0_18 = arith.constant 0 : index
    %20 = vector.load %arg0[%c1, %c0_17, %c0_18] : memref<8x8x54xf32, #tpu.memory_space<vmem>>, vector<1x8x54xf32>
    %21 = vector.shape_cast %20 : vector<1x8x54xf32> to vector<8x54xf32>
    %cst_19 = arith.constant dense<0.000000e+00> : vector<8x64xf32>
    %22 = tpu.matmul %21, %0, %cst_19 {dimension_numbers = #tpu.dot_dimension_numbers<[1], [0], [0], [1], [0, 0, 1, 1], [], []>} : vector<8x54xf32>, vector<54x64xf32>, vector<8x64xf32> -> vector<8x64xf32>
    %cst_20 = arith.constant dense<0.000000e+00> : vector<8x64xf32>
    %23 = tpu.matmul %13, %1, %cst_20 {dimension_numbers = #tpu.dot_dimension_numbers<[1], [0], [0], [1], [0, 0, 1, 1], [], []>} : vector<8x64xf32>, vector<64x64xf32>, vector<8x64xf32> -> vector<8x64xf32>
    %24 = arith.addf %22, %23 : vector<8x64xf32>
    %25 = arith.addf %24, %2 : vector<8x64xf32>
    %26 = math.tanh %25 : vector<8x64xf32>
    %27 = arith.mulf %26, %3 : vector<8x64xf32>
    %cst_21 = arith.constant dense<0.000000e+00> : vector<8xf32>
    %28 = vector.multi_reduction <add>, %27, %cst_21 [1] : vector<8x64xf32> to vector<8xf32>
    %29 = vector.shape_cast %28 : vector<8xf32> to vector<8x1xf32>
    %30 = arith.mulf %26, %4 : vector<8x64xf32>
    %cst_22 = arith.constant dense<0.000000e+00> : vector<8xf32>
    %31 = vector.multi_reduction <add>, %30, %cst_22 [1] : vector<8x64xf32> to vector<8xf32>
    %32 = vector.shape_cast %31 : vector<8xf32> to vector<8x1xf32>
    %c2 = arith.constant 2 : index
    %c0_23 = arith.constant 0 : index
    %c0_24 = arith.constant 0 : index
    %33 = vector.load %arg0[%c2, %c0_23, %c0_24] : memref<8x8x54xf32, #tpu.memory_space<vmem>>, vector<1x8x54xf32>
    %34 = vector.shape_cast %33 : vector<1x8x54xf32> to vector<8x54xf32>
    %cst_25 = arith.constant dense<0.000000e+00> : vector<8x64xf32>
    %35 = tpu.matmul %34, %0, %cst_25 {dimension_numbers = #tpu.dot_dimension_numbers<[1], [0], [0], [1], [0, 0, 1, 1], [], []>} : vector<8x54xf32>, vector<54x64xf32>, vector<8x64xf32> -> vector<8x64xf32>
    %cst_26 = arith.constant dense<0.000000e+00> : vector<8x64xf32>
    %36 = tpu.matmul %26, %1, %cst_26 {dimension_numbers = #tpu.dot_dimension_numbers<[1], [0], [0], [1], [0, 0, 1, 1], [], []>} : vector<8x64xf32>, vector<64x64xf32>, vector<8x64xf32> -> vector<8x64xf32>
    %37 = arith.addf %35, %36 : vector<8x64xf32>
    %38 = arith.addf %37, %2 : vector<8x64xf32>
    %39 = math.tanh %38 : vector<8x64xf32>
    %40 = arith.mulf %39, %3 : vector<8x64xf32>
    %cst_27 = arith.constant dense<0.000000e+00> : vector<8xf32>
    %41 = vector.multi_reduction <add>, %40, %cst_27 [1] : vector<8x64xf32> to vector<8xf32>
    %42 = vector.shape_cast %41 : vector<8xf32> to vector<8x1xf32>
    %43 = arith.mulf %39, %4 : vector<8x64xf32>
    %cst_28 = arith.constant dense<0.000000e+00> : vector<8xf32>
    %44 = vector.multi_reduction <add>, %43, %cst_28 [1] : vector<8x64xf32> to vector<8xf32>
    %45 = vector.shape_cast %44 : vector<8xf32> to vector<8x1xf32>
    %c3 = arith.constant 3 : index
    %c0_29 = arith.constant 0 : index
    %c0_30 = arith.constant 0 : index
    %46 = vector.load %arg0[%c3, %c0_29, %c0_30] : memref<8x8x54xf32, #tpu.memory_space<vmem>>, vector<1x8x54xf32>
    %47 = vector.shape_cast %46 : vector<1x8x54xf32> to vector<8x54xf32>
    %cst_31 = arith.constant dense<0.000000e+00> : vector<8x64xf32>
    %48 = tpu.matmul %47, %0, %cst_31 {dimension_numbers = #tpu.dot_dimension_numbers<[1], [0], [0], [1], [0, 0, 1, 1], [], []>} : vector<8x54xf32>, vector<54x64xf32>, vector<8x64xf32> -> vector<8x64xf32>
    %cst_32 = arith.constant dense<0.000000e+00> : vector<8x64xf32>
    %49 = tpu.matmul %39, %1, %cst_32 {dimension_numbers = #tpu.dot_dimension_numbers<[1], [0], [0], [1], [0, 0, 1, 1], [], []>} : vector<8x64xf32>, vector<64x64xf32>, vector<8x64xf32> -> vector<8x64xf32>
    %50 = arith.addf %48, %49 : vector<8x64xf32>
    %51 = arith.addf %50, %2 : vector<8x64xf32>
    %52 = math.tanh %51 : vector<8x64xf32>
    %53 = arith.mulf %52, %3 : vector<8x64xf32>
    %cst_33 = arith.constant dense<0.000000e+00> : vector<8xf32>
    %54 = vector.multi_reduction <add>, %53, %cst_33 [1] : vector<8x64xf32> to vector<8xf32>
    %55 = vector.shape_cast %54 : vector<8xf32> to vector<8x1xf32>
    %56 = arith.mulf %52, %4 : vector<8x64xf32>
    %cst_34 = arith.constant dense<0.000000e+00> : vector<8xf32>
    %57 = vector.multi_reduction <add>, %56, %cst_34 [1] : vector<8x64xf32> to vector<8xf32>
    %58 = vector.shape_cast %57 : vector<8xf32> to vector<8x1xf32>
    %c4 = arith.constant 4 : index
    %c0_35 = arith.constant 0 : index
    %c0_36 = arith.constant 0 : index
    %59 = vector.load %arg0[%c4, %c0_35, %c0_36] : memref<8x8x54xf32, #tpu.memory_space<vmem>>, vector<1x8x54xf32>
    %60 = vector.shape_cast %59 : vector<1x8x54xf32> to vector<8x54xf32>
    %cst_37 = arith.constant dense<0.000000e+00> : vector<8x64xf32>
    %61 = tpu.matmul %60, %0, %cst_37 {dimension_numbers = #tpu.dot_dimension_numbers<[1], [0], [0], [1], [0, 0, 1, 1], [], []>} : vector<8x54xf32>, vector<54x64xf32>, vector<8x64xf32> -> vector<8x64xf32>
    %cst_38 = arith.constant dense<0.000000e+00> : vector<8x64xf32>
    %62 = tpu.matmul %52, %1, %cst_38 {dimension_numbers = #tpu.dot_dimension_numbers<[1], [0], [0], [1], [0, 0, 1, 1], [], []>} : vector<8x64xf32>, vector<64x64xf32>, vector<8x64xf32> -> vector<8x64xf32>
    %63 = arith.addf %61, %62 : vector<8x64xf32>
    %64 = arith.addf %63, %2 : vector<8x64xf32>
    %65 = math.tanh %64 : vector<8x64xf32>
    %66 = arith.mulf %65, %3 : vector<8x64xf32>
    %cst_39 = arith.constant dense<0.000000e+00> : vector<8xf32>
    %67 = vector.multi_reduction <add>, %66, %cst_39 [1] : vector<8x64xf32> to vector<8xf32>
    %68 = vector.shape_cast %67 : vector<8xf32> to vector<8x1xf32>
    %69 = arith.mulf %65, %4 : vector<8x64xf32>
    %cst_40 = arith.constant dense<0.000000e+00> : vector<8xf32>
    %70 = vector.multi_reduction <add>, %69, %cst_40 [1] : vector<8x64xf32> to vector<8xf32>
    %71 = vector.shape_cast %70 : vector<8xf32> to vector<8x1xf32>
    %c5 = arith.constant 5 : index
    %c0_41 = arith.constant 0 : index
    %c0_42 = arith.constant 0 : index
    %72 = vector.load %arg0[%c5, %c0_41, %c0_42] : memref<8x8x54xf32, #tpu.memory_space<vmem>>, vector<1x8x54xf32>
    %73 = vector.shape_cast %72 : vector<1x8x54xf32> to vector<8x54xf32>
    %cst_43 = arith.constant dense<0.000000e+00> : vector<8x64xf32>
    %74 = tpu.matmul %73, %0, %cst_43 {dimension_numbers = #tpu.dot_dimension_numbers<[1], [0], [0], [1], [0, 0, 1, 1], [], []>} : vector<8x54xf32>, vector<54x64xf32>, vector<8x64xf32> -> vector<8x64xf32>
    %cst_44 = arith.constant dense<0.000000e+00> : vector<8x64xf32>
    %75 = tpu.matmul %65, %1, %cst_44 {dimension_numbers = #tpu.dot_dimension_numbers<[1], [0], [0], [1], [0, 0, 1, 1], [], []>} : vector<8x64xf32>, vector<64x64xf32>, vector<8x64xf32> -> vector<8x64xf32>
    %76 = arith.addf %74, %75 : vector<8x64xf32>
    %77 = arith.addf %76, %2 : vector<8x64xf32>
    %78 = math.tanh %77 : vector<8x64xf32>
    %79 = arith.mulf %78, %3 : vector<8x64xf32>
    %cst_45 = arith.constant dense<0.000000e+00> : vector<8xf32>
    %80 = vector.multi_reduction <add>, %79, %cst_45 [1] : vector<8x64xf32> to vector<8xf32>
    %81 = vector.shape_cast %80 : vector<8xf32> to vector<8x1xf32>
    %82 = arith.mulf %78, %4 : vector<8x64xf32>
    %cst_46 = arith.constant dense<0.000000e+00> : vector<8xf32>
    %83 = vector.multi_reduction <add>, %82, %cst_46 [1] : vector<8x64xf32> to vector<8xf32>
    %84 = vector.shape_cast %83 : vector<8xf32> to vector<8x1xf32>
    %c6 = arith.constant 6 : index
    %c0_47 = arith.constant 0 : index
    %c0_48 = arith.constant 0 : index
    %85 = vector.load %arg0[%c6, %c0_47, %c0_48] : memref<8x8x54xf32, #tpu.memory_space<vmem>>, vector<1x8x54xf32>
    %86 = vector.shape_cast %85 : vector<1x8x54xf32> to vector<8x54xf32>
    %cst_49 = arith.constant dense<0.000000e+00> : vector<8x64xf32>
    %87 = tpu.matmul %86, %0, %cst_49 {dimension_numbers = #tpu.dot_dimension_numbers<[1], [0], [0], [1], [0, 0, 1, 1], [], []>} : vector<8x54xf32>, vector<54x64xf32>, vector<8x64xf32> -> vector<8x64xf32>
    %cst_50 = arith.constant dense<0.000000e+00> : vector<8x64xf32>
    %88 = tpu.matmul %78, %1, %cst_50 {dimension_numbers = #tpu.dot_dimension_numbers<[1], [0], [0], [1], [0, 0, 1, 1], [], []>} : vector<8x64xf32>, vector<64x64xf32>, vector<8x64xf32> -> vector<8x64xf32>
    %89 = arith.addf %87, %88 : vector<8x64xf32>
    %90 = arith.addf %89, %2 : vector<8x64xf32>
    %91 = math.tanh %90 : vector<8x64xf32>
    %92 = arith.mulf %91, %3 : vector<8x64xf32>
    %cst_51 = arith.constant dense<0.000000e+00> : vector<8xf32>
    %93 = vector.multi_reduction <add>, %92, %cst_51 [1] : vector<8x64xf32> to vector<8xf32>
    %94 = vector.shape_cast %93 : vector<8xf32> to vector<8x1xf32>
    %95 = arith.mulf %91, %4 : vector<8x64xf32>
    %cst_52 = arith.constant dense<0.000000e+00> : vector<8xf32>
    %96 = vector.multi_reduction <add>, %95, %cst_52 [1] : vector<8x64xf32> to vector<8xf32>
    %97 = vector.shape_cast %96 : vector<8xf32> to vector<8x1xf32>
    %c7 = arith.constant 7 : index
    %c0_53 = arith.constant 0 : index
    %c0_54 = arith.constant 0 : index
    %98 = vector.load %arg0[%c7, %c0_53, %c0_54] : memref<8x8x54xf32, #tpu.memory_space<vmem>>, vector<1x8x54xf32>
    %99 = vector.shape_cast %98 : vector<1x8x54xf32> to vector<8x54xf32>
    %cst_55 = arith.constant dense<0.000000e+00> : vector<8x64xf32>
    %100 = tpu.matmul %99, %0, %cst_55 {dimension_numbers = #tpu.dot_dimension_numbers<[1], [0], [0], [1], [0, 0, 1, 1], [], []>} : vector<8x54xf32>, vector<54x64xf32>, vector<8x64xf32> -> vector<8x64xf32>
    %cst_56 = arith.constant dense<0.000000e+00> : vector<8x64xf32>
    %101 = tpu.matmul %91, %1, %cst_56 {dimension_numbers = #tpu.dot_dimension_numbers<[1], [0], [0], [1], [0, 0, 1, 1], [], []>} : vector<8x64xf32>, vector<64x64xf32>, vector<8x64xf32> -> vector<8x64xf32>
    %102 = arith.addf %100, %101 : vector<8x64xf32>
    %103 = arith.addf %102, %2 : vector<8x64xf32>
    %104 = math.tanh %103 : vector<8x64xf32>
    %105 = arith.mulf %104, %3 : vector<8x64xf32>
    %cst_57 = arith.constant dense<0.000000e+00> : vector<8xf32>
    %106 = vector.multi_reduction <add>, %105, %cst_57 [1] : vector<8x64xf32> to vector<8xf32>
    %107 = vector.shape_cast %106 : vector<8xf32> to vector<8x1xf32>
    %108 = arith.mulf %104, %4 : vector<8x64xf32>
    %cst_58 = arith.constant dense<0.000000e+00> : vector<8xf32>
    %109 = vector.multi_reduction <add>, %108, %cst_58 [1] : vector<8x64xf32> to vector<8xf32>
    %110 = vector.shape_cast %109 : vector<8xf32> to vector<8x1xf32>
    %111 = arith.addf %16, %110 : vector<8x1xf32>
    %112 = arith.addf %29, %97 : vector<8x1xf32>
    %113 = arith.addf %42, %84 : vector<8x1xf32>
    %114 = arith.addf %55, %71 : vector<8x1xf32>
    %115 = arith.addf %68, %58 : vector<8x1xf32>
    %116 = arith.addf %81, %45 : vector<8x1xf32>
    %117 = arith.addf %94, %32 : vector<8x1xf32>
    %118 = arith.addf %107, %19 : vector<8x1xf32>
    %119 = tpu.concatenate %111, %112, %113, %114, %115, %116, %117, %118 in 1 : vector<8x1xf32>, vector<8x1xf32>, vector<8x1xf32>, vector<8x1xf32>, vector<8x1xf32>, vector<8x1xf32>, vector<8x1xf32>, vector<8x1xf32> -> vector<8x8xf32>
    %120 = vector.broadcast %5 : f32 to vector<8x8xf32>
    %121 = arith.addf %119, %120 : vector<8x8xf32>
    %122 = arith.negf %121 : vector<8x8xf32>
    %123 = math.exp %122 : vector<8x8xf32>
    %cst_59 = arith.constant 1.000000e+00 : f32
    %124 = vector.broadcast %cst_59 : f32 to vector<8x8xf32>
    %125 = arith.addf %124, %123 : vector<8x8xf32>
    %126 = arith.divf %124, %125 : vector<8x8xf32>
    %c0_60 = arith.constant 0 : index
    %c0_61 = arith.constant 0 : index
    %127 = vector.load %arg7[%c0_60, %c0_61] : memref<8x8xf32, #tpu.memory_space<vmem>>, vector<8x8xf32>
    tpu.vector_store %arg7[%c0_60, %c0_61], %126 {strides = array<i32>} : memref<8x8xf32, #tpu.memory_space<vmem>>, vector<8x8xf32>,
    return
  }
}

</mosaic_0001>

<bundles_post_ra>
// kernel: tpu_custom_call.1
= control target key start
LH: loop header
LB: loop body
LE: loop exit
PB: predicated region body
PF: predicated region fallthrough
CT: control target
= control target key end

     0   :  { %13 = vsyncpa [#allocation4], 0  ;;  %s2568_s0 = inlined_call_operand.hbm [shape: f32[8,8,54], index: 0, kind: input, shape index: {}]   ;;  %s2569_s1 = inlined_call_operand.hbm [shape: f32[54,64], index: 1, kind: input, shape index: {}]   ;;  %s2570_s2 = inlined_call_operand.hbm [shape: f32[64,64], index: 2, kind: input, shape index: {}]   ;;  %s2571_s3 = inlined_call_operand.vmem [shape: f32[8,64], index: 3, kind: input, shape index: {}]   ;;  %s2572_s4 = inlined_call_operand.vmem [shape: f32[8,64], index: 4, kind: input, shape index: {}]   ;;  %s2573_s5 = inlined_call_operand.hbm [shape: f32[8,64], index: 5, kind: input, shape index: {}]   ;;  %s2574_s6 = inlined_call_operand.<no memory space> [shape: f32[1], index: 6, kind: input, shape index: {}]   ;;  %s2575_s7 = inlined_call_operand.hbm [shape: f32[8,8], index: 7, kind: output, shape index: {}]  }
   0x1   :  { %14 = vsyncpa [#allocation7], 0 }
   0x2   :  { %15 = vsyncpa [#allocation10], 0 }
   0x3   :  { %16 = vsyncpa [#allocation5], 0  ;;  %s2182_s24 = smov [#allocation6]   ;;  %s2183_s26 = smov [#allocation3]  }
   0x4   :  { %s34_s25 = sshll.u32 %s2182_s24, 4  ;;  %s22_s27 = sshll.u32 %s2183_s26, 4  ;;  %s35_s25 = int_to_ptr.vmem [resolvable:$true] %s34_s25  ;;  %s2232_s27 = int_to_ptr.vmem [resolvable:$true] %s22_s27 }
   0x5   :  { %s2064_s30 = scalar_lea.hbm %s2569_s1, 896 }
   0x6   :  { %p2065_p0 = scmp.ne.s32.totalorder %s2569_s1, %s2064_s30  ;;  %p2068_p1 = scmp.lt.u32.totalorder %s2064_s30, %s2569_s1 }
   0x8   :  { %p2070_p2 = pnand %p2068_p1, %p2065_p0 }
   0xa   :  { %2073 = shalt.err (!%p2070_p2)
}
   0xb   :  { %s2074_s12 = scalar_lea.vmem %s35_s25, 896  ;;  %p2079_p4 = scmp.lt.s32.totalorder %s35_s25, %s35_s25 }
   0xc   :  { %p2075_p3 = scmp.ne.s32.totalorder %s35_s25, %s2074_s12  ;;  %p2080_p5 = scmp.lt.s32.totalorder %s2074_s12, %s2074_s12 }
   0xe   :  { %p2081_p6 = por %p2080_p5, %p2079_p4 }
  0x10   :  { %p2082_p7 = pnand %p2081_p6, %p2075_p3 }
  0x12   :  { %2085 = shalt.err (!%p2082_p7)
}
  0x13   :  { %s2184_s13 = smov 128   ;;  %s2185_s14 = smov 8  }
  0x14   :  { %40 = dma.hbm_to_vmem [thread:$0]  %s2569_s1, 896, %s35_s25, [#allocation7], %s2184_s13, %s2184_s13, %s2185_s14  }
  0x15   :  { %s2086_s19 = scalar_lea.hbm %s2568_s0, 1024 }
  0x16   :  { %p2087_p8 = scmp.ne.s32.totalorder %s2568_s0, %s2086_s19  ;;  %p2090_p9 = scmp.lt.u32.totalorder %s2086_s19, %s2568_s0 }
  0x18   :  { %p2092_p10 = pnand %p2090_p9, %p2087_p8 }
  0x1a   :  { %2095 = shalt.err (!%p2092_p10)
}
  0x1b   :  { %s2096_s24 = scalar_lea.vmem %s2232_s27, 1024  ;;  %p2101_p12 = scmp.lt.s32.totalorder %s2232_s27, %s2232_s27 }
  0x1c   :  { %p2097_p11 = scmp.ne.s32.totalorder %s2232_s27, %s2096_s24  ;;  %p2102_p13 = scmp.lt.s32.totalorder %s2096_s24, %s2096_s24 }
  0x1e   :  { %p2103_p0 = por %p2102_p13, %p2101_p12 }
  0x20   :  { %p2104_p1 = pnand %p2103_p0, %p2097_p11 }
  0x22   :  { %2107 = shalt.err (!%p2104_p1)
}
  0x23   :  { %28 = dma.hbm_to_vmem [thread:$0]  %s2568_s0, 1024, %s2232_s27, [#allocation4], %s2184_s13, %s2184_s13, %s2185_s14  }
  0x24   :  { %s2186_s26 = smov [#allocation8]   ;;  %s2187_s29 = smov [#allocation9]  }
  0x25   :  { %s46_s28 = sshll.u32 %s2186_s26, 4  ;;  %s63_s30 = sshll.u32 %s2187_s29, 4  ;;  %s47_s28 = int_to_ptr.vmem [resolvable:$true] %s46_s28  ;;  %s64_s30 = int_to_ptr.vmem [resolvable:$true] %s63_s30 }
  0x26   :  { %s2108_s10 = scalar_lea.hbm %s2570_s2, 1024 }
  0x27   :  { %p2109_p2 = scmp.ne.s32.totalorder %s2570_s2, %s2108_s10  ;;  %p2112_p3 = scmp.lt.u32.totalorder %s2108_s10, %s2570_s2 }
  0x29   :  { %p2114_p4 = pnand %p2112_p3, %p2109_p2 }
  0x2b   :  { %2117 = shalt.err (!%p2114_p4)
}
  0x2c   :  { %s2118_s0 = scalar_lea.vmem %s47_s28, 1024  ;;  %p2123_p6 = scmp.lt.s32.totalorder %s47_s28, %s47_s28 }
  0x2d   :  { %p2119_p5 = scmp.ne.s32.totalorder %s47_s28, %s2118_s0  ;;  %p2124_p7 = scmp.lt.s32.totalorder %s2118_s0, %s2118_s0 }
  0x2f   :  { %p2125_p8 = por %p2124_p7, %p2123_p6 }
  0x31   :  { %p2126_p9 = pnand %p2125_p8, %p2119_p5 }
  0x33   :  { %2129 = shalt.err (!%p2126_p9)
}
  0x34   :  { %52 = dma.hbm_to_vmem [thread:$0]  %s2570_s2, 1024, %s47_s28, [#allocation7], %s2184_s13, %s2184_s13, %s2185_s14  }
  0x35   :  { %s2130_s20 = scalar_lea.hbm %s2573_s5, 128 }
  0x36   :  { %p2131_p10 = scmp.ne.s32.totalorder %s2573_s5, %s2130_s20  ;;  %p2134_p11 = scmp.lt.u32.totalorder %s2130_s20, %s2573_s5 }
  0x38   :  { %p2136_p12 = pnand %p2134_p11, %p2131_p10 }
  0x3a   :  { %2139 = shalt.err (!%p2136_p12)
}
  0x3b   :  { %s2140_s1 = scalar_lea.vmem %s64_s30, 128  ;;  %p2145_p0 = scmp.lt.s32.totalorder %s64_s30, %s64_s30 }
  0x3c   :  { %p2141_p13 = scmp.ne.s32.totalorder %s64_s30, %s2140_s1  ;;  %p2146_p1 = scmp.lt.s32.totalorder %s2140_s1, %s2140_s1 }
  0x3e   :  { %p2147_p2 = por %p2146_p1, %p2145_p0 }
  0x40   :  { %p2148_p3 = pnand %p2147_p2, %p2141_p13 }
  0x42   :  { %2151 = shalt.err (!%p2148_p3)
}
  0x43   :  { %66 = dma.hbm_to_vmem [thread:$0]  %s2573_s5, 128, %s64_s30, [#allocation10]  }
  0x44   :  { %2174 = dma.done.wait [#allocation4], 1024  }
  0x45   :  { %2175 = vsyncadd [#allocation4], 4294966272 }
  0x46   :  { %2176 = dma.done.wait [#allocation7], 1920  }
  0x47   :  { %2177 = vsyncadd [#allocation7], 4294965376 }
  0x48   :  { %2178 = dma.done.wait [#allocation10], 128  }
  0x49   :  { %2179 = vsyncadd [#allocation10], 4294967168  ;;  %v2188_v0 = vmov 0.0|0.0   ;;  %vm2189_vm0 = vmmov 0   ;;  %v2190_v1 = vmov 0.0   ;;  %v88_v2 = vld [vmem:[#allocation8] sm:$0xff] }
  0x4a   :  { %1866 = vmatprep.subr.bf16.mxu0 %v2188_v0  ;;  %1878 = vmatprep.subr.bf16.mxu1 %v2188_v0  ;;  %v89_v3 = vld [vmem:[#allocation8 + $0x8] sm:$0xff]  ;;  %v82_v6 = vld [vmem:[#allocation6 + $0x8] sm:$0xff]  ;;  %v91_v8 = vld [vmem:[#allocation8 + $0x18] sm:$0xff]  ;;  %vm179_vm1 = vcmask 1045504   ;;  %vm175_vm2 = vcmask 441344   ;;  %vm101_vm3 = vcmask 523264  }
  0x4b   :  { %1611 = vmatprep.mubr.msk.f32.mxu1 %vm2189_vm0, %v2190_v1  ;;  %1594 = vmatprep.mubr.msk.f32.mxu0 %vm2189_vm0, %v2190_v1  ;;  %v81_v4 = vld [vmem:[#allocation6] sm:$0xff]  ;;  %v2302_v5 = vpack.c.bf16 %v89_v3, %v88_v2  ;;  %v90_v7 = vld [vmem:[#allocation8 + $0x10] sm:$0xff]  ;;  %v83_v10 = vld [vmem:[#allocation6 + $0x10] sm:$0xff]  ;;  %vm1377_vm4 = vcmask 7168   ;;  %vm1379_vm5 = vcmask 15360   ;;  %vm1381_vm6 = vcmask 23552  }
  0x4c   :  { %v2304_v9 = vpack.c.bf16 %v82_v6, %v81_v4  ;;  %v84_v11 = vld [vmem:[#allocation6 + $0x18] sm:$0xff]  ;;  %v2307_v12 = vpack.c.bf16 %v91_v8, %v90_v7  ;;  %v93_v15 = vld [vmem:[#allocation8 + $0x28] sm:$0xff]  ;;  %v86_v17 = vld [vmem:[#allocation6 + $0x28] sm:$0xff]  ;;  %vm1383_vm7 = vcmask 31744   ;;  %vm1385_vm8 = vcmask 39936   ;;  %s2191_s28 = smov [#allocation11]  }
  0x4d   :  { %1868 = vmatpush3.bf16.msra.mxu0 %v2302_v5  ;;  %v2311_v13 = vpack.c.bf16 %v84_v11, %v83_v10  ;;  %v92_v14 = vld [vmem:[#allocation8 + $0x20] sm:$0xff]  ;;  %v85_v16 = vld [vmem:[#allocation6 + $0x20] sm:$0xff]  ;;  %v94_v20 = vld [vmem:[#allocation8 + $0x30] sm:$0xff]  ;;  %vm1387_vm9 = vcmask 48128   ;;  %vm1389_vm10 = vcmask 56320   ;;  %s1407_s29 = sshll.u32 %s2191_s28, 4  ;;  %s1408_s29 = int_to_ptr.vmem [resolvable:$true] %s1407_s29 }
  0x4e   :  { %1880 = vmatpush3.bf16.msra.mxu1 %v2304_v9  ;;  %1869 = vmatprep.subr.bf16.mxu0 %v2188_v0  ;;  %v2315_v18 = vpack.c.bf16 %v93_v15, %v92_v14  ;;  %v2319_v19 = vpack.c.bf16 %v86_v17, %v85_v16  ;;  %v95_v21 = vld [vmem:[#allocation8 + $0x38] sm:$0xff]  ;;  %v100_v24 = vld [vmem:[#allocation3] sm:$0xff]  ;;  %v264_v25 = vld [vmem:[#allocation3 + $0x8] sm:$0xff]  ;;  %vm1399_vm11 = vcmask 64512   ;;  %s2152_s30 = scalar_lea.vmem %s1408_s29, 128  ;;  %p2157_p5 = scmp.lt.s32.totalorder %s1408_s29, %s1408_s29 }
  0x4f   :  { %1881 = vmatprep.subr.bf16.mxu1 %v2188_v0  ;;  %v2323_v22 = vpack.c.bf16 %v95_v21, %v94_v20  ;;  %v2328_v23 = vld [vmem:[#allocation6 + $0x30] sm:$0x3f]  ;;  %v2372_v27 = vld [vmem:[%s2571_s3] sm:$0xff]  ;;  %v2412_v46 = vld [vmem:[#allocation9] sm:$0xff]  ;;  %p2153_p4 = scmp.ne.s32.totalorder %s1408_s29, %s2152_s30  ;;  %p2158_p6 = scmp.lt.s32.totalorder %s2152_s30, %s2152_s30 }
  0x50   :  { %v2378_v33 = vld [vmem:[%s2572_s4] sm:$0xff]  ;;  %v422_v39 = vld [vmem:[#allocation3 + $0x10] sm:$0xff]  ;;  %v580_v52 = vld [vmem:[#allocation3 + $0x18] sm:$0xff] }
  0x51   :  { %1871 = vmatpush3.bf16.msra.mxu0 %v2307_v12  ;;  %v738_v2 = vld [vmem:[#allocation3 + $0x20] sm:$0xff]  ;;  %p2159_p7 = por %p2158_p6, %p2157_p5 }
  0x52   :  { %1883 = vmatpush3.bf16.msra.mxu1 %v2311_v13  ;;  %1872 = vmatprep.subr.bf16.mxu0 %v2188_v0 }
  0x53   :  { %1884 = vmatprep.subr.bf16.mxu1 %v2188_v0  ;;  %p2160_p8 = pnand %p2159_p7, %p2153_p4 }
  0x55   :  { %1874 = vmatpush3.bf16.msra.mxu0 %v2315_v18 }
  0x56   :  { %1886 = vmatpush3.bf16.msra.mxu1 %v2319_v19  ;;  %1875 = vmatprep.subr.bf16.mxu0 %v2188_v0 }
  0x57   :  { %1609 = vmatprep.subr.mxu1 %v2190_v1 }
  0x59   :  { %1877 = vmatpush3.bf16.msra.mxu0 %v2323_v22 }
  0x5a   :  { %1610 = vmatpush3.msk.msra.mxu1 %vm179_vm1, %v2328_v23  ;;  %1899 = vmatprep.subr.bf16.mxu0 %v2188_v0 }
  0x5b   :  { %1612 = vmatmul.mubr.msk.f32.vlgmr.msra.gmra.mrb[0].mxu1 %vm175_vm2, %v100_v24  ;;  %1887 = vmatprep.subr.bf16.mxu1 %v2188_v0  ;;  %v896_v24 = vld [vmem:[#allocation3 + $0x28] sm:$0xff] }
  0x5c   :  { %1595 = vmatmul.mubr.f32.vlgmr.msra.gmra.mrb[0].mxu0 %v2190_v1  ;;  %1889 = vmatpush3.bf16.msra.mxu1 %v2302_v5 }
  0x5d   :  { %1901 = vmatpush3.bf16.msra.mxu0 %v2304_v9  ;;  %1890 = vmatprep.subr.bf16.mxu1 %v2188_v0 }
  0x5e   :  { %1902 = vmatprep.subr.bf16.mxu0 %v2188_v0  ;;  %1647 = vmatprep.mubr.msk.f32.mxu0 %vm2189_vm0, %v2190_v1 }
  0x5f   :  { %1630 = vmatprep.mubr.msk.f32.mxu1 %vm2189_vm0, %v2190_v1 }
  0x60   :  { %1892 = vmatpush3.bf16.msra.mxu1 %v2307_v12 }
  0x61   :  { %1904 = vmatpush3.bf16.msra.mxu0 %v2311_v13  ;;  %1893 = vmatprep.subr.bf16.mxu1 %v2188_v0 }
  0x62   :  { %1905 = vmatprep.subr.bf16.mxu0 %v2188_v0 }
  0x64   :  { %1895 = vmatpush3.bf16.msra.mxu1 %v2315_v18 }
  0x65   :  { %1907 = vmatpush3.bf16.msra.mxu0 %v2319_v19  ;;  %1896 = vmatprep.subr.bf16.mxu1 %v2188_v0 }
  0x66   :  { %1645 = vmatprep.subr.mxu0 %v2190_v1 }
  0x68   :  { %1898 = vmatpush3.bf16.msra.mxu1 %v2323_v22 }
  0x69   :  { %1646 = vmatpush3.msk.msra.mxu0 %vm179_vm1, %v2328_v23  ;;  %1920 = vmatprep.subr.bf16.mxu1 %v2188_v0 }
  0x6a   :  { %1908 = vmatprep.subr.bf16.mxu0 %v2188_v0  ;;  %1648 = vmatmul.mubr.msk.f32.vlgmr.msra.gmra.mrb[2].mxu0 %vm175_vm2, %v264_v25 }
  0x6b   :  { %1910 = vmatpush3.bf16.msra.mxu0 %v2302_v5  ;;  %1666 = vmatprep.mubr.msk.f32.mxu0 %vm2189_vm0, %v2190_v1 }
  0x6c   :  { %1911 = vmatprep.subr.bf16.mxu0 %v2188_v0 }
  0x6f   :  { %1913 = vmatpush3.bf16.msra.mxu0 %v2307_v12 }
  0x70   :  { %1914 = vmatprep.subr.bf16.mxu0 %v2188_v0 }
  0x73   :  { %1916 = vmatpush3.bf16.msra.mxu0 %v2315_v18 }
  0x74   :  { %1917 = vmatprep.subr.bf16.mxu0 %v2188_v0 }
  0x77   :  { %1919 = vmatpush3.bf16.msra.mxu0 %v2323_v22 }
  0x78   :  { %1941 = vmatprep.subr.bf16.mxu0 %v2188_v0 }
 0x12e   :  { %v249_v26 = vpop.f32.mrb[0].mxu1 }
 0x12f   :  { %v171_v28 = vpop.f32.mrb[0].mxu0  ;;  %v1613_v29 = vpop.f32.mrb[1].mxu1 }
 0x130   :  { %v250_v30 = vadd.f32 %v249_v26, %v171_v28  ;;  %v1596_v31 = vpop.f32.mrb[1].mxu0 }
 0x132   :  { %v253_v32 = vadd.f32 %v250_v30, %v2372_v27 }
 0x134   :  { %2044 = vtanh.f32 %v253_v32 }
 0x13d   :  { %v407_v37 = vpop.f32.mrb[2].mxu0 }
 0x13e   :  { %v2380_v34 = vpop.eup %2044  ;;  %v1649_v38 = vpop.f32.mrb[3].mxu0 }
 0x13f   :  { %1631 = vmatmul.mubr.msk.f32.vlgmr.msra.gmra.mrb[2].mxu1 %vm101_vm3, %v2380_v34  ;;  %v255_v35 = vmul.f32 %v2380_v34, %v2378_v33  ;;  %v259_v16 = vmul.f32 %v2380_v34, %v2412_v46  ;;  %v1054_v38 = vld [vmem:[#allocation3 + $0x30] sm:$0xff] }
 0x140   :  { %1922 = vmatpush3.bf16.msra.mxu1 %v2304_v9  ;;  %1683 = vmatprep.mubr.msk.f32.mxu1 %vm2189_vm0, %v2190_v1 }
 0x141   :  { %v256_v36 = vsel %vm101_vm3, %v255_v35, 0.0  ;;  %1923 = vmatprep.subr.bf16.mxu1 %v2188_v0  ;;  %v260_v17 = vsel %vm101_vm3, %v259_v16, 0.0 }
 0x142   :  { %257 = vadd.xlane.f32.xlu0 %v256_v36 }
 0x144   :  { %1925 = vmatpush3.bf16.msra.mxu1 %v2311_v13 }
 0x145   :  { %1926 = vmatprep.subr.bf16.mxu1 %v2188_v0 }
 0x148   :  { %1928 = vmatpush3.bf16.msra.mxu1 %v2319_v19 }
 0x149   :  { %1681 = vmatprep.subr.mxu1 %v2190_v1 }
 0x14c   :  { %1682 = vmatpush3.msk.msra.mxu1 %vm179_vm1, %v2328_v23 }
 0x14d   :  { %1929 = vmatprep.subr.bf16.mxu1 %v2188_v0  ;;  %1684 = vmatmul.mubr.msk.f32.vlgmr.msra.gmra.mrb[4].mxu1 %vm175_vm2, %v422_v39 }
 0x14e   :  { %1931 = vmatpush3.bf16.msra.mxu1 %v2302_v5  ;;  %1702 = vmatprep.mubr.msk.f32.mxu1 %vm2189_vm0, %v2190_v1 }
 0x14f   :  { %1932 = vmatprep.subr.bf16.mxu1 %v2188_v0 }
 0x152   :  { %1934 = vmatpush3.bf16.msra.mxu1 %v2307_v12 }
 0x153   :  { %1935 = vmatprep.subr.bf16.mxu1 %v2188_v0 }
 0x156   :  { %1937 = vmatpush3.bf16.msra.mxu1 %v2315_v18 }
 0x157   :  { %1938 = vmatprep.subr.bf16.mxu1 %v2188_v0 }
 0x15a   :  { %1940 = vmatpush3.bf16.msra.mxu1 %v2323_v22 }
 0x15b   :  { %1962 = vmatprep.subr.bf16.mxu1 %v2188_v0 }
 0x212   :  { %v334_v40 = vpop.f32.mrb[2].mxu1 }
 0x213   :  { %v408_v41 = vadd.f32 %v407_v37, %v334_v40  ;;  %v1632_v42 = vpop.f32.mrb[3].mxu1 }
 0x215   :  { %v411_v43 = vadd.f32 %v408_v41, %v2372_v27 }
 0x217   :  { %2046 = vtanh.f32 %v411_v43 }
 0x220   :  { %v565_v50 = vpop.f32.mrb[4].mxu1 }
 0x221   :  { %v2047_v44 = vpop.eup %2046  ;;  %v1685_v51 = vpop.f32.mrb[5].mxu1 }
 0x222   :  { %1667 = vmatmul.mubr.msk.f32.vlgmr.msra.gmra.mrb[4].mxu0 %vm101_vm3, %v2047_v44  ;;  %v413_v45 = vmul.f32 %v2047_v44, %v2378_v33  ;;  %v417_v48 = vmul.f32 %v2047_v44, %v2412_v46 }
 0x223   :  { %1943 = vmatpush3.bf16.msra.mxu0 %v2304_v9  ;;  %1719 = vmatprep.mubr.msk.f32.mxu0 %vm2189_vm0, %v2190_v1 }
 0x224   :  { %v414_v47 = vsel %vm101_vm3, %v413_v45, 0.0  ;;  %1944 = vmatprep.subr.bf16.mxu0 %v2188_v0  ;;  %v418_v49 = vsel %vm101_vm3, %v417_v48, 0.0  ;;  %v1212_v45 = vld [vmem:[#allocation3 + $0x38] sm:$0xff] }
 0x225   :  { %415 = vadd.xlane.f32.xlu0 %v414_v47 }
 0x227   :  { %1946 = vmatpush3.bf16.msra.mxu0 %v2311_v13 }
 0x228   :  { %1947 = vmatprep.subr.bf16.mxu0 %v2188_v0 }
 0x229   :  { %419 = vadd.xlane.f32.xlu0 %v418_v49 }
 0x22b   :  { %1949 = vmatpush3.bf16.msra.mxu0 %v2319_v19 }
 0x22c   :  { %1717 = vmatprep.subr.mxu0 %v2190_v1 }
 0x22f   :  { %1718 = vmatpush3.msk.msra.mxu0 %vm179_vm1, %v2328_v23 }
 0x230   :  { %1950 = vmatprep.subr.bf16.mxu0 %v2188_v0  ;;  %1720 = vmatmul.mubr.msk.f32.vlgmr.msra.gmra.mrb[6].mxu0 %vm175_vm2, %v580_v52 }
 0x231   :  { %1952 = vmatpush3.bf16.msra.mxu0 %v2302_v5  ;;  %1738 = vmatprep.mubr.msk.f32.mxu0 %vm2189_vm0, %v2190_v1 }
 0x232   :  { %1953 = vmatprep.subr.bf16.mxu0 %v2188_v0 }
 0x235   :  { %1955 = vmatpush3.bf16.msra.mxu0 %v2307_v12 }
 0x236   :  { %1956 = vmatprep.subr.bf16.mxu0 %v2188_v0 }
 0x239   :  { %1958 = vmatpush3.bf16.msra.mxu0 %v2315_v18 }
 0x23a   :  { %1959 = vmatprep.subr.bf16.mxu0 %v2188_v0 }
 0x23d   :  { %1961 = vmatpush3.bf16.msra.mxu0 %v2323_v22 }
 0x23e   :  { %1983 = vmatprep.subr.bf16.mxu0 %v2188_v0 }
 0x2f5   :  { %v492_v53 = vpop.f32.mrb[4].mxu0 }
 0x2f6   :  { %v566_v54 = vadd.f32 %v565_v50, %v492_v53  ;;  %v1668_v55 = vpop.f32.mrb[5].mxu0 }
 0x2f8   :  { %v569_v56 = vadd.f32 %v566_v54, %v2372_v27 }
 0x2fa   :  { %2048 = vtanh.f32 %v569_v56 }
 0x303   :  { %v723_v62 = vpop.f32.mrb[6].mxu0 }
 0x304   :  { %v2049_v57 = vpop.eup %2048  ;;  %v1721_v63 = vpop.f32.mrb[7].mxu0 }
 0x305   :  { %1703 = vmatmul.mubr.msk.f32.vlgmr.msra.gmra.mrb[6].mxu1 %vm101_vm3, %v2049_v57  ;;  %v571_v58 = vmul.f32 %v2049_v57, %v2378_v33  ;;  %v575_v60 = vmul.f32 %v2049_v57, %v2412_v46 }
 0x306   :  { %1964 = vmatpush3.bf16.msra.mxu1 %v2304_v9  ;;  %1755 = vmatprep.mubr.msk.f32.mxu1 %vm2189_vm0, %v2190_v1 }
 0x307   :  { %v572_v59 = vsel %vm101_vm3, %v571_v58, 0.0  ;;  %1965 = vmatprep.subr.bf16.mxu1 %v2188_v0  ;;  %v576_v61 = vsel %vm101_vm3, %v575_v60, 0.0 }
 0x308   :  { %573 = vadd.xlane.f32.xlu0 %v572_v59 }
 0x30a   :  { %1967 = vmatpush3.bf16.msra.mxu1 %v2311_v13 }
 0x30b   :  { %1968 = vmatprep.subr.bf16.mxu1 %v2188_v0 }
 0x30c   :  { %577 = vadd.xlane.f32.xlu0 %v576_v61 }
 0x30e   :  { %1970 = vmatpush3.bf16.msra.mxu1 %v2319_v19 }
 0x30f   :  { %1753 = vmatprep.subr.mxu1 %v2190_v1 }
 0x312   :  { %1754 = vmatpush3.msk.msra.mxu1 %vm179_vm1, %v2328_v23 }
 0x313   :  { %1971 = vmatprep.subr.bf16.mxu1 %v2188_v0  ;;  %1756 = vmatmul.mubr.msk.f32.vlgmr.msra.gmra.mrb[8].mxu1 %vm175_vm2, %v738_v2 }
 0x314   :  { %1973 = vmatpush3.bf16.msra.mxu1 %v2302_v5  ;;  %1774 = vmatprep.mubr.msk.f32.mxu1 %vm2189_vm0, %v2190_v1 }
 0x315   :  { %1974 = vmatprep.subr.bf16.mxu1 %v2188_v0 }
 0x318   :  { %1976 = vmatpush3.bf16.msra.mxu1 %v2307_v12 }
 0x319   :  { %1977 = vmatprep.subr.bf16.mxu1 %v2188_v0 }
 0x31c   :  { %1979 = vmatpush3.bf16.msra.mxu1 %v2315_v18 }
 0x31d   :  { %1980 = vmatprep.subr.bf16.mxu1 %v2188_v0 }
 0x320   :  { %1982 = vmatpush3.bf16.msra.mxu1 %v2323_v22 }
 0x321   :  { %2004 = vmatprep.subr.bf16.mxu1 %v2188_v0 }
 0x3d8   :  { %v650_v3 = vpop.f32.mrb[6].mxu1 }
 0x3d9   :  { %v724_v4 = vadd.f32 %v723_v62, %v650_v3  ;;  %v1704_v6 = vpop.f32.mrb[7].mxu1  ;;  %v258_v62 = vpop.xlane.xlu0 %257 }
 0x3db   :  { %v727_v7 = vadd.f32 %v724_v4, %v2372_v27 }
 0x3dd   :  { %2050 = vtanh.f32 %v727_v7  ;;  %v416_v63 = vpop.xlane.xlu0 %415 }
 0x3e1   :  { %v420_v2 = vpop.xlane.xlu0 %419 }
 0x3e5   :  { %v574_v4 = vpop.xlane.xlu0 %573 }
 0x3e6   :  { %v881_v20 = vpop.f32.mrb[8].mxu1 }
 0x3e7   :  { %v2051_v8 = vpop.eup %2050  ;;  %v1757_v21 = vpop.f32.mrb[9].mxu1 }
 0x3e8   :  { %1739 = vmatmul.mubr.msk.f32.vlgmr.msra.gmra.mrb[8].mxu0 %vm101_vm3, %v2051_v8  ;;  %v729_v10 = vmul.f32 %v2051_v8, %v2378_v33  ;;  %v733_v14 = vmul.f32 %v2051_v8, %v2412_v46 }
 0x3e9   :  { %1985 = vmatpush3.bf16.msra.mxu0 %v2304_v9  ;;  %1791 = vmatprep.mubr.msk.f32.mxu0 %vm2189_vm0, %v2190_v1  ;;  %v578_v6 = vpop.xlane.xlu0 %577 }
 0x3ea   :  { %v730_v11 = vsel %vm101_vm3, %v729_v10, 0.0  ;;  %1986 = vmatprep.subr.bf16.mxu0 %v2188_v0  ;;  %v734_v15 = vsel %vm101_vm3, %v733_v14, 0.0 }
 0x3eb   :  { %731 = vadd.xlane.f32.xlu0 %v730_v11 }
 0x3ed   :  { %1988 = vmatpush3.bf16.msra.mxu0 %v2311_v13 }
 0x3ee   :  { %1989 = vmatprep.subr.bf16.mxu0 %v2188_v0 }
 0x3ef   :  { %735 = vadd.xlane.f32.xlu0 %v734_v15 }
 0x3f1   :  { %1991 = vmatpush3.bf16.msra.mxu0 %v2319_v19 }
 0x3f2   :  { %1789 = vmatprep.subr.mxu0 %v2190_v1 }
 0x3f3   :  { %261 = vadd.xlane.f32.xlu0 %v260_v17 }
 0x3f5   :  { %1790 = vmatpush3.msk.msra.mxu0 %vm179_vm1, %v2328_v23 }
 0x3f6   :  { %1992 = vmatprep.subr.bf16.mxu0 %v2188_v0  ;;  %1792 = vmatmul.mubr.msk.f32.vlgmr.msra.gmra.mrb[10].mxu0 %vm175_vm2, %v896_v24 }
 0x3f7   :  { %1994 = vmatpush3.bf16.msra.mxu0 %v2302_v5  ;;  %1810 = vmatprep.mubr.msk.f32.mxu0 %vm2189_vm0, %v2190_v1 }
 0x3f8   :  { %1995 = vmatprep.subr.bf16.mxu0 %v2188_v0 }
 0x3fb   :  { %1997 = vmatpush3.bf16.msra.mxu0 %v2307_v12 }
 0x3fc   :  { %1998 = vmatprep.subr.bf16.mxu0 %v2188_v0 }
 0x3ff   :  { %2000 = vmatpush3.bf16.msra.mxu0 %v2315_v18 }
 0x400   :  { %2001 = vmatprep.subr.bf16.mxu0 %v2188_v0 }
 0x403   :  { %2003 = vmatpush3.bf16.msra.mxu0 %v2323_v22 }
 0x404   :  { %2025 = vmatprep.subr.bf16.mxu0 %v2188_v0 }
 0x478   :  { %v732_v8 = vpop.xlane.xlu0 %731 }
 0x47c   :  { %v736_v15 = vpop.xlane.xlu0 %735 }
 0x4bb   :  { %v808_v25 = vpop.f32.mrb[8].mxu0 }
 0x4bc   :  { %v882_v26 = vadd.f32 %v881_v20, %v808_v25  ;;  %v1740_v28 = vpop.f32.mrb[9].mxu0 }
 0x4be   :  { %v885_v29 = vadd.f32 %v882_v26, %v2372_v27 }
 0x4c0   :  { %2052 = vtanh.f32 %v885_v29 }
 0x4c9   :  { %v1039_v36 = vpop.f32.mrb[10].mxu0 }
 0x4ca   :  { %v2053_v30 = vpop.eup %2052  ;;  %v1793_v37 = vpop.f32.mrb[11].mxu0 }
 0x4cb   :  { %1775 = vmatmul.mubr.msk.f32.vlgmr.msra.gmra.mrb[10].mxu1 %vm101_vm3, %v2053_v30  ;;  %v891_v31 = vmul.f32 %v2053_v30, %v2412_v46  ;;  %v887_v34 = vmul.f32 %v2053_v30, %v2378_v33 }
 0x4cc   :  { %2006 = vmatpush3.bf16.msra.mxu1 %v2304_v9  ;;  %1827 = vmatprep.mubr.msk.f32.mxu1 %vm2189_vm0, %v2190_v1 }
 0x4cd   :  { %v892_v32 = vsel %vm101_vm3, %v891_v31, 0.0  ;;  %2007 = vmatprep.subr.bf16.mxu1 %v2188_v0  ;;  %v888_v35 = vsel %vm101_vm3, %v887_v34, 0.0 }
 0x4ce   :  { %893 = vadd.xlane.f32.xlu1 %v892_v32  ;;  %v262_v32 = vpop.xlane.xlu0 %261 }
 0x4d0   :  { %2009 = vmatpush3.bf16.msra.mxu1 %v2311_v13 }
 0x4d1   :  { %2010 = vmatprep.subr.bf16.mxu1 %v2188_v0 }
 0x4d2   :  { %889 = vadd.xlane.f32.xlu1 %v888_v35  ;;  %v1391_v35 = vstv %s2574_s6 }
 0x4d4   :  { %2012 = vmatpush3.bf16.msra.mxu1 %v2319_v19 }
 0x4d5   :  { %1825 = vmatprep.subr.mxu1 %v2190_v1 }
 0x4d8   :  { %1826 = vmatpush3.msk.msra.mxu1 %vm179_vm1, %v2328_v23 }
 0x4d9   :  { %2013 = vmatprep.subr.bf16.mxu1 %v2188_v0  ;;  %1828 = vmatmul.mubr.msk.f32.vlgmr.msra.gmra.mrb[12].mxu1 %vm175_vm2, %v1054_v38 }
 0x4da   :  { %2015 = vmatpush3.bf16.msra.mxu1 %v2302_v5  ;;  %1846 = vmatprep.mubr.msk.f32.mxu1 %vm2189_vm0, %v2190_v1 }
 0x4db   :  { %2016 = vmatprep.subr.bf16.mxu1 %v2188_v0 }
 0x4de   :  { %2018 = vmatpush3.bf16.msra.mxu1 %v2307_v12 }
 0x4df   :  { %2019 = vmatprep.subr.bf16.mxu1 %v2188_v0 }
 0x4e2   :  { %2021 = vmatpush3.bf16.msra.mxu1 %v2315_v18 }
 0x4e3   :  { %2022 = vmatprep.subr.bf16.mxu1 %v2188_v0 }
 0x4e6   :  { %2024 = vmatpush3.bf16.msra.mxu1 %v2323_v22 }
 0x59e   :  { %v966_v39 = vpop.f32.mrb[10].mxu1 }
 0x59f   :  { %v1040_v40 = vadd.f32 %v1039_v36, %v966_v39  ;;  %v1776_v41 = vpop.f32.mrb[11].mxu1 }
 0x5a1   :  { %v1043_v5 = vadd.f32 %v1040_v40, %v2372_v27 }
 0x5a3   :  { %2054 = vtanh.f32 %v1043_v5 }
 0x5ad   :  { %v2055_v42 = vpop.eup %2054 }
 0x5ae   :  { %1811 = vmatmul.mubr.msk.f32.vlgmr.msra.gmra.mrb[12].mxu0 %vm101_vm3, %v2055_v42  ;;  %v1049_v43 = vmul.f32 %v2055_v42, %v2412_v46  ;;  %v1045_v18 = vmul.f32 %v2055_v42, %v2378_v33 }
 0x5af   :  { %2027 = vmatpush3.bf16.msra.mxu0 %v2304_v9  ;;  %1863 = vmatprep.mubr.msk.f32.mxu0 %vm2189_vm0, %v2190_v1  ;;  %v1197_v9 = vpop.f32.mrb[12].mxu1 }
 0x5b0   :  { %v1050_v12 = vsel %vm101_vm3, %v1049_v43, 0.0  ;;  %2028 = vmatprep.subr.bf16.mxu0 %v2188_v0  ;;  %v1046_v22 = vsel %vm101_vm3, %v1045_v18, 0.0  ;;  %v1829_v44 = vpop.f32.mrb[13].mxu1 }
 0x5b1   :  { %1051 = vadd.xlane.f32.xlu1 %v1050_v12 }
 0x5b3   :  { %2030 = vmatpush3.bf16.msra.mxu0 %v2311_v13 }
 0x5b4   :  { %2031 = vmatprep.subr.bf16.mxu0 %v2188_v0 }
 0x5b5   :  { %1047 = vadd.xlane.f32.xlu1 %v1046_v22 }
 0x5b7   :  { %2033 = vmatpush3.bf16.msra.mxu0 %v2319_v19 }
 0x5b8   :  { %1861 = vmatprep.subr.mxu0 %v2190_v1 }
 0x5bb   :  { %1862 = vmatpush3.msk.msra.mxu0 %vm179_vm1, %v2328_v23 }
 0x5bc   :  { %1864 = vmatmul.mubr.msk.f32.vlgmr.msra.gmra.mrb[14].mxu0 %vm175_vm2, %v1212_v45 }
 0x681   :  { %v1124_v47 = vpop.f32.mrb[12].mxu0 }
 0x682   :  { %v1198_v48 = vadd.f32 %v1197_v9, %v1124_v47  ;;  %v1812_v13 = vpop.f32.mrb[13].mxu0 }
 0x684   :  { %v1201_v49 = vadd.f32 %v1198_v48, %v2372_v27 }
 0x686   :  { %2056 = vtanh.f32 %v1201_v49 }
 0x68f   :  { %v1355_v23 = vpop.f32.mrb[14].mxu0 }
 0x690   :  { %v2057_v0 = vpop.eup %2056  ;;  %v1865_v50 = vpop.f32.mrb[15].mxu0 }
 0x691   :  { %1847 = vmatmul.mubr.msk.f32.vlgmr.msra.gmra.mrb[14].mxu1 %vm101_vm3, %v2057_v0  ;;  %v1207_v19 = vmul.f32 %v2057_v0, %v2412_v46  ;;  %v1203_v58 = vmul.f32 %v2057_v0, %v2378_v33 }
 0x693   :  { %v1208_v1 = vsel %vm101_vm3, %v1207_v19, 0.0  ;;  %v1204_v59 = vsel %vm101_vm3, %v1203_v58, 0.0 }
 0x694   :  { %1209 = vadd.xlane.f32.xlu1 %v1208_v1 }
 0x764   :  { %v1282_v51 = vpop.f32.mrb[14].mxu1 }
 0x765   :  { %v1356_v52 = vadd.f32 %v1355_v23, %v1282_v51  ;;  %v1848_v53 = vpop.f32.mrb[15].mxu1 }
 0x767   :  { %v1359_v54 = vadd.f32 %v1356_v52, %v2372_v27  ;;  %v894_v27 = vpop.xlane.xlu1 %893 }
 0x768   :  { %v1372_v17 = vadd.f32 %v894_v27, %v732_v8 }
 0x769   :  { %2058 = vtanh.f32 %v1359_v54 }
 0x76b   :  { %v890_v3 = vpop.xlane.xlu1 %889 }
 0x76c   :  { %v1373_v21 = vadd.f32 %v890_v3, %v736_v15 }
 0x773   :  { %v2059_v55 = vpop.eup %2058 }
 0x774   :  { %v1365_v56 = vmul.f32 %v2059_v55, %v2412_v46  ;;  %v1361_v60 = vmul.f32 %v2059_v55, %v2378_v33  ;;  %v1052_v46 = vpop.xlane.xlu1 %1051 }
 0x775   :  { %v1371_v16 = vadd.f32 %v1052_v46, %v574_v4 }
 0x776   :  { %v1366_v57 = vsel %vm101_vm3, %v1365_v56, 0.0  ;;  %v1362_v61 = vsel %vm101_vm3, %v1361_v60, 0.0 }
 0x777   :  { %1367 = vadd.xlane.f32.xlu1 %v1366_v57 }
 0x778   :  { %v1048_v7 = vpop.xlane.xlu1 %1047 }
 0x779   :  { %v1374_v26 = vadd.f32 %v1048_v7, %v578_v6 }
 0x77b   :  { %1205 = vadd.xlane.f32.xlu1 %v1204_v59 }
 0x77c   :  { %v1210_v10 = vpop.xlane.xlu1 %1209 }
 0x77d   :  { %v1370_v14 = vadd.f32 %v1210_v10, %v416_v63 }
 0x77f   :  { %1363 = vadd.xlane.f32.xlu1 %v1362_v61 }
 0x804   :  { %v1368_v11 = vpop.xlane.xlu1 %1367 }
 0x805   :  { %v1369_v33 = vadd.f32 %v1368_v11, %v258_v62 }
 0x807   :  { %v1378_v20 = vsel %vm1377_vm4, %v1369_v33, %v1370_v14 }
 0x808   :  { %v1380_v24 = vsel %vm1379_vm5, %v1378_v20, %v1371_v16  ;;  %v1206_v25 = vpop.xlane.xlu1 %1205 }
 0x809   :  { %v1382_v28 = vsel %vm1381_vm6, %v1380_v24, %v1372_v17  ;;  %v1375_v30 = vadd.f32 %v1206_v25, %v420_v2 }
 0x80a   :  { %v1384_v29 = vsel %vm1383_vm7, %v1382_v28, %v1373_v21 }
 0x80b   :  { %v1386_v31 = vsel %vm1385_vm8, %v1384_v29, %v1374_v26 }
 0x80c   :  { %v1364_v34 = vpop.xlane.xlu1 %1363  ;;  %v1388_v37 = vsel %vm1387_vm9, %v1386_v31, %v1375_v30 }
 0x80d   :  { %v1376_v36 = vadd.f32 %v1364_v34, %v262_v32 }
 0x80f   :  { %v1390_v38 = vsel %vm1389_vm10, %v1388_v37, %v1376_v36 }
 0x810   :  { %v1392_v39 = vadd.f32 %v1391_v35, %v1390_v38 }
 0x812   :  { %v1441_v40 = vmul.f32 -1.442695, %v1392_v39 }
 0x814   :  { %2060 = vpow2.f32 %v1441_v40 }
 0x81e   :  { %v2061_v41 = vpop.eup %2060 }
 0x81f   :  { %v1396_v5 = vadd.f32 1.0, %v2061_v41 }
 0x821   :  { %2062 = vrcp.f32 %v1396_v5 }
 0x82b   :  { %v2063_v42 = vpop.eup %2062 }
 0x82c   :  { %1400 = vst.msk [vmem:[#allocation11] sm:$0xff] %vm1399_vm11, %v2063_v42 }
 0x82d   :  { %2163 = shalt.err (!%p2160_p8)
}
 0x82e   :  { %s2164_s9 = scalar_lea.hbm %s2575_s7, 128 }
 0x82f   :  { %p2165_p9 = scmp.ne.s32.totalorder %s2575_s7, %s2164_s9  ;;  %p2168_p10 = scmp.lt.u32.totalorder %s2164_s9, %s2575_s7 }
 0x831   :  { %p2170_p11 = pnand %p2168_p10, %p2165_p9 }
 0x833   :  { %2173 = shalt.err (!%p2170_p11)
}
 0x834   :  { %1410 = dma.vmem_to_hbm [thread:$0]  %s1408_s29, 128, %s2575_s7, [#allocation5]  }
 0x835   :  { %2180 = dma.done.wait [#allocation5], 128  }
 0x836   :  { %2181 = vsyncadd [#allocation5], 4294967168 }
 0x837   :  { %1414 = vsyncpa [#allocation4], 1 }
 0x838   :  { %1415 = vsyncpa [#allocation7], 1 }
 0x839   :  { %1416 = vsyncpa [#allocation10], 1 }
 0x83a   :  { %1417 = vsyncpa [#allocation5], 1 }

</bundles_post_ra>
